<compile_context>
chip_gen: v7x
topology: tpu7x:2x2x1
jax: 0.10.0
libtpu: 0.0.40
codegen_flags: <defaults>
</compile_context>

<pallas_src>
import jax
import jax.numpy as jnp
from jax.experimental import pallas as pl
from jax.experimental.pallas import tpu as pltpu

_SCORE_LANES = 128  # lane-dense width of the per-node score table (review item #9)


def _round_up(x, m):
    return (x + m - 1) // m * m


def _mean_adjacency(edge_index, num_nodes):
    """Dense mean-aggregation operator of PyG SAGEConv (scatter-mean semantics).

    A[i, j] = (#edges j->i) / max(in_degree(i), 1); isolated nodes aggregate to 0.
    TODO(synk): data-dependent scatter-add has no clean Pallas equivalent; this is
    one-time XLA preprocessing of the constant registered edge_index buffer.
    """
    src = edge_index[0].astype(jnp.int32)
    dst = edge_index[1].astype(jnp.int32)
    a = jnp.zeros((num_nodes, num_nodes), jnp.float32).at[dst, src].add(1.0)
    deg = jnp.zeros((num_nodes,), jnp.float32).at[dst].add(1.0)
    return a / jnp.maximum(deg, 1.0)[:, None]


def prepare_params(params, *, row_block=None):
    """One-time parameter preprocessing (hoisted out of the hot forward path)."""
    f32, bf16 = jnp.float32, jnp.bfloat16

    x = params["vector_tensor"].astype(f32)                 # (N, Cin)
    n, c_in = x.shape
    w1l = params["conv1_lin_l_w"].astype(f32)               # (H, Cin)
    w1r = params["conv1_lin_r_w"].astype(f32)               # (H, Cin)
    b1 = params["conv1_lin_l_b"].astype(f32)                # (H,)
    w2l = params["conv2_lin_l_w"].astype(f32)               # (Cout, H)
    w2r = params["conv2_lin_r_w"].astype(f32)               # (Cout, H)
    b2 = params["conv2_lin_l_b"].astype(f32)                # (Cout,)
    wc = params["cls_w"].astype(f32)                        # (1, 2*Cin)
    bc = params["cls_b"].astype(f32)                        # (1,)

    hidden = w1l.shape[0]
    c_out = w2l.shape[0]
    # The Linear(2*in_channels, 1) head consumes cat([h2[i], h2[j]]) -> Cout must == Cin.
    assert wc.shape == (1, 2 * c_in) and c_out == c_in, (
        "classifier requires conv2 out_channels == in_channels")

    # Row-block size for streaming the (N, N) aggregation matrix.  512 bf16 rows
    # double-buffered stays well inside v7x's 64 MiB VMEM and v5e's 16 MiB default
    # scoped limit; on v5e/v6e (128 MiB) row_block=1024 is also fine for large graphs.
    n8 = _round_up(n, 8)
    tm = _round_up(row_block, 8) if row_block is not None else min(512, n8)
    n_pad = _round_up(n8, tm)

    # Dense mean-aggregation operator, built ONCE and cached (review item #1).
    a = _mean_adjacency(params["edge_index"], n)
    a_pad = jnp.zeros((n_pad, n_pad), f32).at[:n, :n].set(a)
    x_pad = jnp.zeros((n_pad, c_in), f32).at[:n, :].set(x)

    # Layer 1 projections folded into constants (x is a registered buffer):
    #   h1 = relu(A @ (x @ Wl1.T) + (x @ Wr1.T + b1))
    u1 = x_pad @ w1l.T                       # (N_pad, H)  aggregated operand
    v1 = x_pad @ w1r.T + b1[None, :]         # (N_pad, H)  per-node root term (+bias)

    # Layer 2 + classifier head folded together (everything is linear):
    #   scores[:, k] = (A @ h1) @ (Wl2.T @ wc_k) + h1 @ (Wr2.T @ wc_k) + b2 @ wc_k
    wc_cols = jnp.stack([wc[0, :c_out], wc[0, c_out:]], axis=1)     # (Cout, 2)
    w2lc = jnp.zeros((hidden, _SCORE_LANES), f32).at[:, :2].set(w2l.T @ wc_cols)
    w2rc = jnp.zeros((hidden, _SCORE_LANES), f32).at[:, :2].set(w2r.T @ wc_cols)
    s0 = jnp.zeros((1, _SCORE_LANES), f32).at[:, :2].set(b2[None, :] @ wc_cols)

    return dict(
        a_norm=a_pad.astype(bf16),          # (N_pad, N_pad) bf16 — the streamed operand
        u1=u1.astype(bf16),                 # (N_pad, H) bf16
        v1=v1,                              # (N_pad, H) f32
        w2lc=w2lc.astype(bf16),             # (H, 128) bf16
        w2rc=w2rc.astype(bf16),             # (H, 128) bf16
        s0=s0,                              # (1, 128) f32
        cls_b=bc[0],                        # scalar f32 — added in the wrapper
        num_nodes=n, n_pad=n_pad, row_block=tm, hidden=hidden,
    )


def _sage_layer1_kernel(a_ref, u_ref, v_ref, h1_ref):
    """h1[blk] = relu(A[blk] @ u1 + v1[blk]);  bf16 MXU operands, f32 accumulation."""
    agg = jnp.dot(a_ref[...], u_ref[...], preferred_element_type=jnp.float32)
    h1_ref[...] = jnp.maximum(agg + v_ref[...], 0.0).astype(h1_ref.dtype)


def _sage_layer2_scores_kernel(a_ref, h_all_ref, h_blk_ref, wl_ref, wr_ref, s0_ref, s_ref):
    """scores[blk] = (A[blk] @ h1) @ (Wl2.T Wc) + h1[blk] @ (Wr2.T Wc) + b2 Wc.

    Lane-dense (TM, 128) output (columns 0/1 hold the article1/article2 score halves);
    all dots are MXU-native (no transposes), f32 accumulation.
    """
    f32 = jnp.float32
    agg = jnp.dot(a_ref[...], h_all_ref[...], preferred_element_type=f32)
    s_ref[...] = (jnp.dot(agg.astype(jnp.bfloat16), wl_ref[...], preferred_element_type=f32)
                  + jnp.dot(h_blk_ref[...], wr_ref[...], preferred_element_type=f32)
                  + s0_ref[...])


def no_cross_sage_encoder_forward(prep, article1_idx, article2_idx, labels=None):
    """Forward pass of NoCrossSAGEEncoderModel. Returns (loss, logits)."""
    n_pad, tm, hidden = prep["n_pad"], prep["row_block"], prep["hidden"]
    grid = (n_pad // tm,)
    cp = pltpu.CompilerParams(dimension_semantics=("parallel",))  # v7x: shard across 2 TCs

    def resident(shape):
        return pl.BlockSpec(shape, lambda i: (0, 0))

    def row_blk(shape):
        return pl.BlockSpec(shape, lambda i: (i, 0))

    # ---- Pass 1: SAGEConv(Cin -> 16) + ReLU, streaming (TM, N) row blocks of A ----
    h1 = pl.pallas_call(
        _sage_layer1_kernel,
        out_shape=jax.ShapeDtypeStruct((n_pad, hidden), jnp.bfloat16),
        grid=grid,
        in_specs=[
            row_blk((tm, n_pad)),        # A row block — only large, pipelined operand
            resident((n_pad, hidden)),   # u1 = x @ Wl1.T (resident)
            row_blk((tm, hidden)),       # v1 = x @ Wr1.T + b1 (row block)
        ],
        out_specs=row_blk((tm, hidden)),
        compiler_params=cp,
    )(prep["a_norm"], prep["u1"], prep["v1"])

    # ---- Pass 2: SAGEConv(16 -> Cout) folded with the Linear head -> score table ----
    scores = pl.pallas_call(
        _sage_layer2_scores_kernel,
        out_shape=jax.ShapeDtypeStruct((n_pad, _SCORE_LANES), jnp.float32),
        grid=grid,
        in_specs=[
            row_blk((tm, n_pad)),                 # A row block
            resident((n_pad, hidden)),            # full h1 (aggregation operand)
            row_blk((tm, hidden)),                # h1 row block (root term)
            resident((hidden, _SCORE_LANES)),     # Wl2.T @ Wc (padded to 128 lanes)
            resident((hidden, _SCORE_LANES)),     # Wr2.T @ Wc
            resident((1, _SCORE_LANES)),          # b2 @ Wc
        ],
        out_specs=row_blk((tm, _SCORE_LANES)),
        compiler_params=cp,
    )(prep["a_norm"], h1, h1, prep["w2lc"], prep["w2rc"], prep["s0"])

    idx1 = article1_idx.astype(jnp.int32)
    idx2 = article2_idx.astype(jnp.int32)
    # Per-pair combination: two scalar gathers + add + bias, one vectorized XLA op.
    logits = (scores[idx1, 0] + scores[idx2, 1] + prep["cls_b"]).reshape(-1, 1)

    loss = None
    if labels is not None:
        z = logits.reshape(-1)
        y = labels.astype(jnp.float32).reshape(-1)
        # Numerically stable BCE-with-logits, mean reduction.
        loss = jnp.mean(jnp.maximum(z, 0.0) - z * y + jnp.log1p(jnp.exp(-jnp.abs(z))))
    return loss, logits


if __name__ == "__main__":
    key = jax.random.PRNGKey(0)
    ks = jax.random.split(key, 12)

    num_nodes = 64
    in_channels = 32
    hidden = 16              # conv1 output size is hard-coded to 16 in the module
    out_channels = 32        # must equal in_channels for the Linear(2*in_channels, 1) head
    num_edges = 256
    batch = 16

    def linear_init(kw, kb, fan_out, fan_in, bias=True):
        bound = 1.0 / jnp.sqrt(jnp.float32(fan_in))
        w = jax.random.uniform(kw, (fan_out, fan_in), minval=-bound, maxval=bound,
                               dtype=jnp.float32)
        b = (jax.random.uniform(kb, (fan_out,), minval=-bound, maxval=bound,
                                dtype=jnp.float32) if bias else None)
        return w, b

    vector_tensor = jax.random.normal(ks[0], (num_nodes, in_channels), dtype=jnp.float32)
    src = jax.random.randint(ks[1], (num_edges,), 0, num_nodes, dtype=jnp.int32)
    dst = jax.random.randint(ks[2], (num_edges,), 0, num_nodes, dtype=jnp.int32)
    edge_index = jnp.stack([src, dst], axis=0)

    w1l, b1l = linear_init(ks[3], ks[4], hidden, in_channels)            # conv1.lin_l
    w1r, _ = linear_init(ks[5], ks[5], hidden, in_channels, bias=False)  # conv1.lin_r
    w2l, b2l = linear_init(ks[6], ks[7], out_channels, hidden)           # conv2.lin_l
    w2r, _ = linear_init(ks[8], ks[8], out_channels, hidden, bias=False) # conv2.lin_r
    wc, bc = linear_init(ks[9], ks[10], 1, 2 * in_channels)              # classifier

    article1_idx = jax.random.randint(ks[11], (batch,), 0, num_nodes, dtype=jnp.int32)
    article2_idx = jax.random.randint(jax.random.fold_in(key, 99), (batch,), 0,
                                      num_nodes, dtype=jnp.int32)
    labels = jax.random.randint(jax.random.fold_in(key, 123), (batch,), 0, 2,
                                dtype=jnp.int32)

    params = dict(
        vector_tensor=vector_tensor, edge_index=edge_index,
        conv1_lin_l_w=w1l, conv1_lin_l_b=b1l, conv1_lin_r_w=w1r,
        conv2_lin_l_w=w2l, conv2_lin_l_b=b2l, conv2_lin_r_w=w2r,
        cls_w=wc, cls_b=bc)

    prep = prepare_params(params)                       # one-time preprocessing
    loss, logits = no_cross_sage_encoder_forward(prep, article1_idx, article2_idx, labels)
    jax.block_until_ready(logits)
    jax.block_until_ready(loss)

    # ---- Pure-JAX reference (same math as the PyTorch forward), full f32 precision ----
    hp = jax.lax.Precision.HIGHEST
    a_norm = _mean_adjacency(edge_index, num_nodes)
    agg1 = jnp.dot(a_norm, vector_tensor, precision=hp)
    h1_ref = jnp.maximum(jnp.dot(agg1, w1l.T, precision=hp) + b1l
                         + jnp.dot(vector_tensor, w1r.T, precision=hp), 0.0)
    agg2 = jnp.dot(a_norm, h1_ref, precision=hp)
    h2_ref = (jnp.dot(agg2, w2l.T, precision=hp) + b2l
              + jnp.dot(h1_ref, w2r.T, precision=hp))
    combined = jnp.concatenate([h2_ref[article1_idx], h2_ref[article2_idx]], axis=1)
    ref_logits = jnp.dot(combined, wc.T, precision=hp) + bc
    zr = ref_logits.reshape(-1)
    yr = labels.astype(jnp.float32)
    ref_loss = jnp.mean(jnp.maximum(zr, 0.0) - zr * yr + jnp.log1p(jnp.exp(-jnp.abs(zr))))

    assert jnp.allclose(logits, ref_logits, atol=3e-2, rtol=3e-2), "logits mismatch"
    assert jnp.allclose(loss, ref_loss, atol=3e-2, rtol=3e-2), "loss mismatch"

    print("KERNEL_OK")
</pallas_src>

<mosaic_0001>
module attributes {stable_mosaic.version = 11 : i64} {
  func.func @_sage_layer1_kernel(%arg0: i32, %arg1: memref<64x64xbf16, #tpu.memory_space<vmem>>, %arg2: memref<64x16xbf16, #tpu.memory_space<vmem>>, %arg3: memref<64x16xf32, #tpu.memory_space<vmem>>, %arg4: memref<64x16xbf16, #tpu.memory_space<vmem>>) attributes {dimension_semantics = [#tpu.dimension_semantics<parallel>], iteration_bounds = array<i64: 1>, scalar_prefetch = 0 : i64, scratch_operands = 0 : i64, tpu.core_type = #tpu.core_type<tc>, window_params = [{transform_indices = @transform_0, window_bounds = array<i64: 64, 64>}, {pipeline_mode = #tpu.pipeline_mode<synchronous>, transform_indices = @transform_1, window_bounds = array<i64: 64, 16>}, {transform_indices = @transform_2, window_bounds = array<i64: 64, 16>}, {transform_indices = @transform_3, window_bounds = array<i64: 64, 16>}]} {
    %c0 = arith.constant 0 : index
    %c0_0 = arith.constant 0 : index
    %0 = vector.load %arg1[%c0, %c0_0] : memref<64x64xbf16, #tpu.memory_space<vmem>>, vector<64x64xbf16>
    %c0_1 = arith.constant 0 : index
    %c0_2 = arith.constant 0 : index
    %1 = vector.load %arg2[%c0_1, %c0_2] : memref<64x16xbf16, #tpu.memory_space<vmem>>, vector<64x16xbf16>
    %cst = arith.constant dense<0.000000e+00> : vector<64x16xf32>
    %2 = tpu.matmul %0, %1, %cst {dimension_numbers = #tpu.dot_dimension_numbers<[1], [0], [0], [1], [0, 0, 1, 1], [], []>} : vector<64x64xbf16>, vector<64x16xbf16>, vector<64x16xf32> -> vector<64x16xf32>
    %c0_3 = arith.constant 0 : index
    %c0_4 = arith.constant 0 : index
    %3 = vector.load %arg3[%c0_3, %c0_4] : memref<64x16xf32, #tpu.memory_space<vmem>>, vector<64x16xf32>
    %4 = arith.addf %2, %3 : vector<64x16xf32>
    %cst_5 = arith.constant 0.000000e+00 : f32
    %5 = vector.broadcast %cst_5 : f32 to vector<64x16xf32>
    %6 = arith.maximumf %4, %5 : vector<64x16xf32>
    %7 = arith.truncf %6 : vector<64x16xf32> to vector<64x16xbf16>
    %c0_6 = arith.constant 0 : index
    %c0_7 = arith.constant 0 : index
    %8 = vector.load %arg4[%c0_6, %c0_7] : memref<64x16xbf16, #tpu.memory_space<vmem>>, vector<64x16xbf16>
    tpu.vector_store %arg4[%c0_6, %c0_7], %7 {strides = array<i32>} : memref<64x16xbf16, #tpu.memory_space<vmem>>, vector<64x16xbf16>,
    return
  }
  func.func @transform_0(%arg0: i32) -> (i32, i32) {
    %c0_i32 = arith.constant 0 : i32
    %c0_i32_0 = arith.constant 0 : i32
    return %arg0, %c0_i32 : i32, i32
  }
  func.func @transform_1(%arg0: i32) -> (i32, i32) {
    %c0_i32 = arith.constant 0 : i32
    %c0_i32_0 = arith.constant 0 : i32
    %c0_i32_1 = arith.constant 0 : i32
    return %c0_i32, %c0_i32_0 : i32, i32
  }
  func.func @transform_2(%arg0: i32) -> (i32, i32) {
    %c0_i32 = arith.constant 0 : i32
    %c0_i32_0 = arith.constant 0 : i32
    return %arg0, %c0_i32 : i32, i32
  }
  func.func @transform_3(%arg0: i32) -> (i32, i32) {
    %c0_i32 = arith.constant 0 : i32
    %c0_i32_0 = arith.constant 0 : i32
    return %arg0, %c0_i32 : i32, i32
  }
}

</mosaic_0001>

<bundles_post_ra>
// kernel: tpu_custom_call.1
= control target key start
LH: loop header
LB: loop body
LE: loop exit
PB: predicated region body
PF: predicated region fallthrough
CT: control target
= control target key end

     0   :  { %vm83_vm0 = vcmask 523264   ;;  %vm201_vm1 = vcmask 125952   ;;  %s386_s1 = inlined_call_operand.vmem [shape: bf16[64,16], index: 1, kind: input, shape index: {}]   ;;  %s387_s0 = inlined_call_operand.vmem [shape: bf16[64,64], index: 0, kind: input, shape index: {}]   ;;  %s388_s2 = inlined_call_operand.vmem [shape: f32[64,16], index: 2, kind: input, shape index: {}]   ;;  %s389_s3 = inlined_call_operand.vmem [shape: bf16[64,16], index: 3, kind: output, shape index: {}]  }
   0x1   :  { %v274_v0 = vld [vmem:[%s386_s1] sm:$0xff]   ;;  %v275_v1 = vld [vmem:[%s386_s1 + $0x8] sm:$0xff]   ;;  %v276_v2 = vld [vmem:[%s386_s1 + $0x10] sm:$0xff]  }
   0x2   :  { %250 = vmatprep.subr.bf16.mxu0 %v274_v0  ;;  %266 = vmatprep.subr.bf16.mxu1 %v274_v0  ;;  %v278_v3 = vld [vmem:[%s387_s0] sm:$0xff]   ;;  %v279_v4 = vld [vmem:[%s387_s0 + $0x10] sm:$0xff]   ;;  %v277_v5 = vld [vmem:[%s386_s1 + $0x18] sm:$0xff]  }
   0x3   :  { %251 = vmatpush3.bf16.msra.mxu0 %v274_v0  ;;  %270 = vmatpush3.bf16.msra.mxu1 %v274_v0  ;;  %v280_v6 = vld [vmem:[%s387_s0 + $0x8] sm:$0xff]   ;;  %v281_v7 = vld [vmem:[%s387_s0 + $0x18] sm:$0xff]   ;;  %v33_v8 = vld [vmem:[%s388_s2 + $0x10] sm:$0xff] }
   0x4   :  { %252 = vmatprep.subr.bf16.mxu0 %v275_v1  ;;  %267 = vmatprep.subr.bf16.mxu1 %v275_v1  ;;  %v37_v9 = vld [vmem:[%s388_s2 + $0x30] sm:$0xff]  ;;  %v31_v10 = vld [vmem:[%s388_s2] sm:$0xff]  ;;  %v34_v14 = vld [vmem:[%s388_s2 + $0x18] sm:$0xff] }
   0x5   :  { %258 = vmatprep.mubr.msk.bf16.mxu0 %vm83_vm0, %v278_v3  ;;  %262 = vmatprep.mubr.msk.bf16.mxu1 %vm83_vm0, %v279_v4  ;;  %v35_v11 = vld [vmem:[%s388_s2 + $0x20] sm:$0xff]  ;;  %v38_v15 = vld [vmem:[%s388_s2 + $0x38] sm:$0xff]  ;;  %v32_v20 = vld [vmem:[%s388_s2 + $0x8] sm:$0xff] }
   0x6   :  { %v36_v21 = vld [vmem:[%s388_s2 + $0x28] sm:$0xff] }
   0x7   :  { %253 = vmatpush3.bf16.msra.mxu0 %v275_v1  ;;  %271 = vmatpush3.bf16.msra.mxu1 %v275_v1 }
   0x8   :  { %254 = vmatprep.subr.bf16.mxu0 %v276_v2  ;;  %268 = vmatprep.subr.bf16.mxu1 %v276_v2 }
   0xb   :  { %255 = vmatpush3.bf16.msra.mxu0 %v276_v2  ;;  %272 = vmatpush3.bf16.msra.mxu1 %v276_v2 }
   0xc   :  { %256 = vmatprep.subr.bf16.mxu0 %v277_v5  ;;  %269 = vmatprep.subr.bf16.mxu1 %v277_v5 }
   0xf   :  { %257 = vmatpush3.bf16.msra.mxu0 %v277_v5  ;;  %273 = vmatpush3.bf16.msra.mxu1 %v277_v5 }
  0x12   :  { %259 = vmatmul.mubr.msk.bf16.vlgmr.msra.gmra.mrb[0].mxu0 %vm83_vm0, %v280_v6  ;;  %263 = vmatmul.mubr.msk.bf16.vlgmr.msra.gmra.mrb[0].mxu1 %vm83_vm0, %v281_v7 }
  0xe5   :  { %v260_v12 = vpop.f32.mrb[0].mxu0  ;;  %v264_v13 = vpop.f32.mrb[0].mxu1 }
  0xe6   :  { %v139_v16 = vadd.f32 %v260_v12, %v33_v8  ;;  %v155_v17 = vadd.f32 %v264_v13, %v37_v9  ;;  %v130_v18 = vpop.f32.mrb[1].mxu0  ;;  %v146_v19 = vpop.f32.mrb[1].mxu1 }
  0xe7   :  { %v131_v22 = vadd.f32 %v130_v18, %v31_v10  ;;  %v147_v23 = vadd.f32 %v146_v19, %v35_v11  ;;  %v261_v24 = vpop.f32.mrb[2].mxu0  ;;  %v265_v25 = vpop.f32.mrb[2].mxu1 }
  0xe8   :  { %v163_v26 = vmax.f32 %v139_v16, 0.0  ;;  %v167_v27 = vmax.f32 %v155_v17, 0.0  ;;  %v142_v28 = vadd.f32 %v261_v24, %v34_v14  ;;  %v158_v29 = vadd.f32 %v265_v25, %v38_v15  ;;  %v133_v30 = vpop.f32.mrb[3].mxu0  ;;  %v149_v31 = vpop.f32.mrb[3].mxu1 }
  0xe9   :  { %v161_v32 = vmax.f32 %v131_v22, 0.0  ;;  %v165_v33 = vmax.f32 %v147_v23, 0.0  ;;  %v134_v34 = vadd.f32 %v133_v30, %v32_v20  ;;  %v150_v35 = vadd.f32 %v149_v31, %v36_v21 }
  0xea   :  { %v236_v36 = vpack.c.bf16 %v163_v26, %v163_v26  ;;  %v240_v37 = vpack.c.bf16 %v167_v27, %v167_v27  ;;  %v164_v38 = vmax.f32 %v142_v28, 0.0  ;;  %v168_v39 = vmax.f32 %v158_v29, 0.0 }
  0xeb   :  { %v234_v40 = vpack.c.bf16 %v161_v32, %v161_v32  ;;  %v238_v41 = vpack.c.bf16 %v165_v33, %v165_v33  ;;  %v162_v42 = vmax.f32 %v134_v34, 0.0  ;;  %v166_v43 = vmax.f32 %v150_v35, 0.0 }
  0xec   :  { %204 = vst.msk [vmem:[%s389_s3 + $0x8] sm:$0xf] %vm201_vm1, %v236_v36  ;;  %208 = vst.msk [vmem:[%s389_s3 + $0x18] sm:$0xf] %vm201_vm1, %v240_v37  ;;  %v237_v44 = vpack.c.bf16 %v164_v38, %v164_v38  ;;  %v241_v45 = vpack.c.bf16 %v168_v39, %v168_v39 }
  0xed   :  { %202 = vst.msk [vmem:[%s389_s3] sm:$0xf] %vm201_vm1, %v234_v40  ;;  %206 = vst.msk [vmem:[%s389_s3 + $0x10] sm:$0xf] %vm201_vm1, %v238_v41  ;;  %v235_v46 = vpack.c.bf16 %v162_v42, %v162_v42  ;;  %v239_v47 = vpack.c.bf16 %v166_v43, %v166_v43 }
  0xee   :  { %205 = vst.msk [vmem:[%s389_s3 + $0xc] sm:$0xf] %vm201_vm1, %v237_v44  ;;  %209 = vst.msk [vmem:[%s389_s3 + $0x1c] sm:$0xf] %vm201_vm1, %v241_v45 }
  0xef   :  { %203 = vst.msk [vmem:[%s389_s3 + $0x4] sm:$0xf] %vm201_vm1, %v235_v46  ;;  %207 = vst.msk [vmem:[%s389_s3 + $0x14] sm:$0xf] %vm201_vm1, %v239_v47 }

</bundles_post_ra>
